<compile_context>
chip_gen: v6e
topology: v6e:2x2x1
jax: 0.10.0
libtpu: 0.0.40
codegen_flags: <defaults>
</compile_context>

<pallas_src>
import functools

import jax
import jax.numpy as jnp
from jax import lax
from jax.experimental import pallas as pl
from jax.experimental.pallas import tpu as pltpu


def _round_up(a, b):
    return ((a + b - 1) // b) * b


def _vfl_kernel(pred_ref, gt_ref, lab_ref, out_ref, acc_ref, *,
                gamma, alpha, inv_n, lanes, tile_rows, acc_rows,
                tiles_per_core, total_tiles, total_elems,
                needs_mask, has_oob, approx_recip):
    c = pl.program_id(0)
    t = pl.program_id(1)
    tile_idx = c * tiles_per_core + t

    @pl.when(t == 0)
    def _init():
        acc_ref[...] = jnp.zeros_like(acc_ref)

    x = pred_ref[...].astype(jnp.float32)    # logits
    z = gt_ref[...].astype(jnp.float32)      # gt_score
    lab = lab_ref[...].astype(jnp.float32)   # label mask

    # One shared transcendental: e = exp(-|x|) serves both sigmoid and BCE's log1p.
    e = jnp.exp(-jnp.abs(x))
    denom = 1.0 + e
    num = jnp.where(x >= 0, 1.0, e)
    if approx_recip:
        sig = num * pl.reciprocal(denom, approx=True)   # EUP vrcp, frees VALU ops
    else:
        sig = num / denom

    if gamma == 2.0:
        focal = sig * sig                    # no pow -> no extra EUP ops
    else:
        focal = sig ** gamma

    af = alpha * focal
    weight = af + lab * (z - af)             # == alpha*focal*(1-lab) + z*lab

    # Stable BCE-with-logits, reduction='none'.
    bce = jnp.maximum(x, 0.0) - x * z + jnp.log1p(e)
    contrib = bce * weight

    def _accum(vals):
        if acc_rows == tile_rows:
            acc_ref[...] += vals
        else:
            # Layout-preserving regrouping into (groups, 8, lanes); chain of vreg adds.
            acc_ref[...] += vals.reshape(tile_rows // acc_rows, acc_rows, lanes).sum(axis=0)

    last = total_tiles - 1
    if needs_mask or has_oob:
        @pl.when(tile_idx < last)
        def _full_tiles():
            _accum(contrib)

        @pl.when(tile_idx == last)
        def _last_tile():
            if needs_mask:
                rid = lax.broadcasted_iota(jnp.int32, (tile_rows, lanes), 0)
                lid = lax.broadcasted_iota(jnp.int32, (tile_rows, lanes), 1)
                flat = (last * tile_rows * lanes) + rid * lanes + lid   # static base
                _accum(jnp.where(flat < total_elems, contrib, 0.0))
            else:
                _accum(contrib)
        # Tiles with tile_idx > last (clamped OOB tiles of the trailing core) are skipped.
    else:
        _accum(contrib)

    @pl.when(t == pl.num_programs(1) - 1)
    def _finalize():
        partial = jnp.sum(acc_ref[...]) * inv_n
        out_ref[...] = jnp.full((8, 128), partial, dtype=jnp.float32)


def varifocal_loss(pred_score, gt_score, label, gamma: float = 2.0,
                   alpha: float = 0.75, max_tile_rows: int = 1024,
                   num_cores: int = 1, approx_reciprocal: bool = True):
    """Pallas-backed varifocal loss. Returns a scalar float32.

    num_cores=2 enables the outer "parallel" grid axis (useful on 2-TensorCore
    chips, e.g. v7x); it harmlessly serializes on single-TC generations.
    """
    assert pred_score.shape == gt_score.shape == label.shape
    B, N, C = pred_score.shape
    total = B * N * C

    # Sublane alignment implied by the narrowest input dtype (f32:8, bf16:16, int8:32).
    packing = max(1, max(4 // x.dtype.itemsize for x in (pred_score, gt_score, label)))
    sub = 8 * packing

    # Lane-dense flatten; prefer a lane width that divides total -> zero-copy reshape.
    lanes = None
    for cand in (512, 256, 128):
        if total % cand == 0:
            lanes = cand
            break
    if lanes is None:
        lanes = 128   # rare: must pad the tail to a lane multiple (forces one copy)
    rows = pl.cdiv(total, lanes)
    data_elems = rows * lanes

    def _flat(x):
        x = jnp.ravel(x)                              # free for contiguous (B,N,C)
        if data_elems != total:
            x = jnp.pad(x, (0, data_elems - total))   # masked in-kernel, values don't matter
        return x.reshape(rows, lanes)

    pred2d, gt2d, lab2d = _flat(pred_score), _flat(gt_score), _flat(label)

    if rows <= sub:
        tile_rows = rows                              # full-dim block (always legal)
    else:
        tile_rows = min(_round_up(int(max_tile_rows), sub), (rows // sub) * sub)
    acc_rows = 8 if tile_rows % 8 == 0 else tile_rows

    total_tiles = pl.cdiv(rows, tile_rows)
    num_cores = max(1, min(int(num_cores), total_tiles))
    tiles_per_core = pl.cdiv(total_tiles, num_cores)
    has_oob = num_cores * tiles_per_core != total_tiles
    needs_mask = total_tiles * tile_rows * lanes != total

    if has_oob:
        def in_idx(c, t):
            return (jnp.minimum(c * tiles_per_core + t, total_tiles - 1), 0)
    else:
        def in_idx(c, t):
            return (c * tiles_per_core + t, 0)

    kernel = functools.partial(
        _vfl_kernel,
        gamma=float(gamma), alpha=float(alpha), inv_n=1.0 / float(N),
        lanes=lanes, tile_rows=tile_rows, acc_rows=acc_rows,
        tiles_per_core=tiles_per_core, total_tiles=total_tiles,
        total_elems=total, needs_mask=needs_mask, has_oob=has_oob,
        approx_recip=bool(approx_reciprocal),
    )

    in_spec = pl.BlockSpec((tile_rows, lanes), in_idx)

    out = pl.pallas_call(
        kernel,
        out_shape=jax.ShapeDtypeStruct((num_cores * 8, 128), jnp.float32),
        grid_spec=pltpu.PrefetchScalarGridSpec(
            num_scalar_prefetch=0,
            grid=(num_cores, tiles_per_core),
            in_specs=[in_spec, in_spec, in_spec],
            out_specs=pl.BlockSpec((8, 128), lambda c, t: (c, 0)),
            scratch_shapes=[pltpu.VMEM((acc_rows, lanes), jnp.float32)],
        ),
        compiler_params=pltpu.CompilerParams(
            dimension_semantics=("parallel", "arbitrary"),
            vmem_limit_bytes=32 * 1024 * 1024,
        ),
    )(pred2d, gt2d, lab2d)

    partials = out.reshape(num_cores, 8, 128)[:, 0, 0]
    return jnp.sum(partials)


def _reference(pred_score, gt_score, label, gamma=2.0, alpha=0.75):
    x = pred_score.astype(jnp.float32)
    z = gt_score.astype(jnp.float32)
    lab = label.astype(jnp.float32)
    weight = alpha * jax.nn.sigmoid(x) ** gamma * (1.0 - lab) + z * lab
    bce = jnp.maximum(x, 0.0) - x * z + jnp.log1p(jnp.exp(-jnp.abs(x)))
    return (bce * weight).mean(axis=1).sum()


if __name__ == "__main__":
    key = jax.random.PRNGKey(0)
    k1, k2, k3 = jax.random.split(key, 3)

    # --- Case 1: small shape consistent with the module (batch, anchors, classes) ---
    B, N, C = 2, 8, 4
    pred = jax.random.normal(k1, (B, N, C), dtype=jnp.float32) * 2.0
    gt = jax.random.uniform(k2, (B, N, C), dtype=jnp.float32)
    lab = (jax.random.uniform(k3, (B, N, C)) > 0.5).astype(jnp.float32)

    ref = _reference(pred, gt, lab)
    loss = varifocal_loss(pred, gt, lab)
    jax.block_until_ready(loss)
    assert jnp.allclose(loss, ref, rtol=2e-3, atol=1e-3), (loss, ref)

    # Exact-reciprocal path: tight tolerance check of everything else.
    loss_exact = varifocal_loss(pred, gt, lab, approx_reciprocal=False)
    jax.block_until_ready(loss_exact)
    assert jnp.allclose(loss_exact, ref, rtol=1e-4, atol=1e-5), (loss_exact, ref)

    # --- Case 2: detector-like class count; zero-copy reshape (10240 % 512 == 0),
    #     multi-tile accumulation, partial-last-tile masking, and the 2-way core split ---
    k4, k5, k6 = jax.random.split(jax.random.PRNGKey(0), 3)
    B2, N2, C2 = 2, 64, 80
    p2 = jax.random.normal(k4, (B2, N2, C2), dtype=jnp.float32) * 2.0
    g2 = jax.random.uniform(k5, (B2, N2, C2), dtype=jnp.float32)
    l2 = (jax.random.uniform(k6, (B2, N2, C2)) > 0.5).astype(jnp.float32)
    ref2 = _reference(p2, g2, l2)

    loss2 = varifocal_loss(p2, g2, l2)                                  # default tiling
    loss2b = varifocal_loss(p2, g2, l2, max_tile_rows=8, num_cores=2)   # forced multi-tile + core split
    jax.block_until_ready((loss2, loss2b))
    assert jnp.allclose(loss2, ref2, rtol=2e-3, atol=2e-3), (loss2, ref2)
    assert jnp.allclose(loss2b, ref2, rtol=2e-3, atol=2e-3), (loss2b, ref2)

    # --- Case 3: bf16 inputs (halved HBM traffic); in-kernel math stays f32 ---
    k7, k8, k9 = jax.random.split(jax.random.PRNGKey(1), 3)
    B3, N3, C3 = 2, 128, 32
    p3 = (jax.random.normal(k7, (B3, N3, C3), jnp.float32) * 2.0).astype(jnp.bfloat16)
    g3 = jax.random.uniform(k8, (B3, N3, C3), jnp.float32).astype(jnp.bfloat16)
    l3 = (jax.random.uniform(k9, (B3, N3, C3)) > 0.5).astype(jnp.bfloat16)
    ref3 = _reference(p3, g3, l3)
    loss3 = varifocal_loss(p3, g3, l3)
    jax.block_until_ready(loss3)
    assert jnp.allclose(loss3, ref3, rtol=2e-3, atol=2e-3), (loss3, ref3)

    print("KERNEL_OK")
</pallas_src>

<mosaic_0001>
module attributes {stable_mosaic.version = 11 : i64} {
  func.func @_vfl_kernel(%arg0: i32, %arg1: i32, %arg2: memref<1x128xf32, #tpu.memory_space<vmem>>, %arg3: memref<1x128xf32, #tpu.memory_space<vmem>>, %arg4: memref<1x128xf32, #tpu.memory_space<vmem>>, %arg5: memref<8x128xf32, #tpu.memory_space<vmem>>, %arg6: memref<1x128xf32, #tpu.memory_space<vmem>>) attributes {dimension_semantics = [#tpu.dimension_semantics<parallel>, #tpu.dimension_semantics<arbitrary>], iteration_bounds = array<i64: 1, 1>, scalar_prefetch = 0 : i64, scratch_operands = 1 : i64, tpu.core_type = #tpu.core_type<tc>, window_params = [{transform_indices = @transform_0, window_bounds = array<i64: 1, 128>}, {transform_indices = @transform_1, window_bounds = array<i64: 1, 128>}, {transform_indices = @transform_2, window_bounds = array<i64: 1, 128>}, {transform_indices = @transform_3, window_bounds = array<i64: 8, 128>}]} {
    %c1_i32 = arith.constant 1 : i32
    %0 = arith.muli %arg0, %c1_i32 : i32
    %1 = arith.addi %0, %arg1 : i32
    %c0_i32 = arith.constant 0 : i32
    %2 = arith.cmpi eq, %arg1, %c0_i32 : i32
    %3 = arith.extui %2 : i1 to i32
    %c0_i32_0 = arith.constant 0 : i32
    %4 = arith.cmpi ne, %3, %c0_i32_0 : i32
    scf.if %4 {
      %cst_17 = arith.constant 0.000000e+00 : f32
      %42 = vector.broadcast %cst_17 : f32 to vector<1x128xf32>
      %c0_18 = arith.constant 0 : index
      %c0_19 = arith.constant 0 : index
      %43 = vector.load %arg6[%c0_18, %c0_19] : memref<1x128xf32, #tpu.memory_space<vmem>>, vector<1x128xf32>
      tpu.vector_store %arg6[%c0_18, %c0_19], %42 {strides = array<i32>} : memref<1x128xf32, #tpu.memory_space<vmem>>, vector<1x128xf32>,
    } else {
    }
    %c0 = arith.constant 0 : index
    %c0_1 = arith.constant 0 : index
    %5 = vector.load %arg2[%c0, %c0_1] : memref<1x128xf32, #tpu.memory_space<vmem>>, vector<1x128xf32>
    %c0_2 = arith.constant 0 : index
    %c0_3 = arith.constant 0 : index
    %6 = vector.load %arg3[%c0_2, %c0_3] : memref<1x128xf32, #tpu.memory_space<vmem>>, vector<1x128xf32>
    %c0_4 = arith.constant 0 : index
    %c0_5 = arith.constant 0 : index
    %7 = vector.load %arg4[%c0_4, %c0_5] : memref<1x128xf32, #tpu.memory_space<vmem>>, vector<1x128xf32>
    %8 = math.absf %5 : vector<1x128xf32>
    %cst = arith.constant 0.000000e+00 : f32
    %9 = vector.broadcast %cst : f32 to vector<1x128xf32>
    %10 = arith.subf %9, %8 : vector<1x128xf32>
    %11 = math.exp %10 : vector<1x128xf32>
    %cst_6 = arith.constant 1.000000e+00 : f32
    %12 = vector.broadcast %cst_6 : f32 to vector<1x128xf32>
    %13 = arith.addf %12, %11 : vector<1x128xf32>
    %cst_7 = arith.constant 0.000000e+00 : f32
    %14 = vector.broadcast %cst_7 : f32 to vector<1x128xf32>
    %15 = arith.cmpf oge, %5, %14 : vector<1x128xf32>
    %cst_8 = arith.constant 1.000000e+00 : f32
    %16 = vector.broadcast %cst_8 : f32 to vector<1x128xf32>
    %17 = arith.select %15, %16, %11 : vector<1x128xi1>, vector<1x128xf32>
    %18 = tpu.reciprocal %13 {approx = true} : vector<1x128xf32> -> vector<1x128xf32>
    %19 = arith.mulf %17, %18 : vector<1x128xf32>
    %20 = arith.mulf %19, %19 : vector<1x128xf32>
    %cst_9 = arith.constant 7.500000e-01 : f32
    %21 = vector.broadcast %cst_9 : f32 to vector<1x128xf32>
    %22 = arith.mulf %21, %20 : vector<1x128xf32>
    %23 = arith.subf %6, %22 : vector<1x128xf32>
    %24 = arith.mulf %7, %23 : vector<1x128xf32>
    %25 = arith.addf %22, %24 : vector<1x128xf32>
    %cst_10 = arith.constant 0.000000e+00 : f32
    %26 = vector.broadcast %cst_10 : f32 to vector<1x128xf32>
    %27 = arith.maximumf %5, %26 : vector<1x128xf32>
    %28 = arith.mulf %5, %6 : vector<1x128xf32>
    %29 = arith.subf %27, %28 : vector<1x128xf32>
    %30 = math.log1p %11 : vector<1x128xf32>
    %31 = arith.addf %29, %30 : vector<1x128xf32>
    %32 = arith.mulf %31, %25 : vector<1x128xf32>
    %c0_i32_11 = arith.constant 0 : i32
    %33 = arith.cmpi slt, %1, %c0_i32_11 : i32
    %34 = arith.extui %33 : i1 to i32
    %c0_i32_12 = arith.constant 0 : i32
    %35 = arith.cmpi ne, %34, %c0_i32_12 : i32
    scf.if %35 {
      %c0_17 = arith.constant 0 : index
      %c0_18 = arith.constant 0 : index
      %42 = vector.load %arg6[%c0_17, %c0_18] : memref<1x128xf32, #tpu.memory_space<vmem>>, vector<1x128xf32>
      %43 = arith.addf %42, %32 : vector<1x128xf32>
      %c0_19 = arith.constant 0 : index
      %c0_20 = arith.constant 0 : index
      %44 = vector.load %arg6[%c0_19, %c0_20] : memref<1x128xf32, #tpu.memory_space<vmem>>, vector<1x128xf32>
      tpu.vector_store %arg6[%c0_19, %c0_20], %43 {strides = array<i32>} : memref<1x128xf32, #tpu.memory_space<vmem>>, vector<1x128xf32>,
    } else {
    }
    %c0_i32_13 = arith.constant 0 : i32
    %36 = arith.cmpi eq, %1, %c0_i32_13 : i32
    %37 = arith.extui %36 : i1 to i32
    %c0_i32_14 = arith.constant 0 : i32
    %38 = arith.cmpi ne, %37, %c0_i32_14 : i32
    scf.if %38 {
      %42 = tpu.iota {dimensions = array<i32: 0>} : vector<1x128xi32>
      %43 = tpu.iota {dimensions = array<i32: 1>} : vector<1x128xi32>
      %c128_i32 = arith.constant 128 : i32
      %44 = vector.broadcast %c128_i32 : i32 to vector<1x128xi32>
      %45 = arith.muli %42, %44 : vector<1x128xi32>
      %c0_i32_17 = arith.constant 0 : i32
      %46 = vector.broadcast %c0_i32_17 : i32 to vector<1x128xi32>
      %47 = arith.addi %46, %45 : vector<1x128xi32>
      %48 = arith.addi %47, %43 : vector<1x128xi32>
      %c64_i32 = arith.constant 64 : i32
      %49 = vector.broadcast %c64_i32 : i32 to vector<1x128xi32>
      %50 = arith.cmpi slt, %48, %49 : vector<1x128xi32>
      %cst_18 = arith.constant 0.000000e+00 : f32
      %51 = vector.broadcast %cst_18 : f32 to vector<1x128xf32>
      %52 = arith.select %50, %32, %51 : vector<1x128xi1>, vector<1x128xf32>
      %c0_19 = arith.constant 0 : index
      %c0_20 = arith.constant 0 : index
      %53 = vector.load %arg6[%c0_19, %c0_20] : memref<1x128xf32, #tpu.memory_space<vmem>>, vector<1x128xf32>
      %54 = arith.addf %53, %52 : vector<1x128xf32>
      %c0_21 = arith.constant 0 : index
      %c0_22 = arith.constant 0 : index
      %55 = vector.load %arg6[%c0_21, %c0_22] : memref<1x128xf32, #tpu.memory_space<vmem>>, vector<1x128xf32>
      tpu.vector_store %arg6[%c0_21, %c0_22], %54 {strides = array<i32>} : memref<1x128xf32, #tpu.memory_space<vmem>>, vector<1x128xf32>,
    } else {
    }
    %c0_i32_15 = arith.constant 0 : i32
    %39 = arith.cmpi eq, %arg1, %c0_i32_15 : i32
    %40 = arith.extui %39 : i1 to i32
    %c0_i32_16 = arith.constant 0 : i32
    %41 = arith.cmpi ne, %40, %c0_i32_16 : i32
    scf.if %41 {
      %c0_17 = arith.constant 0 : index
      %c0_18 = arith.constant 0 : index
      %42 = vector.load %arg6[%c0_17, %c0_18] : memref<1x128xf32, #tpu.memory_space<vmem>>, vector<1x128xf32>
      %43 = vector.shape_cast %42 : vector<1x128xf32> to vector<1x1x128xf32>
      %cst_19 = arith.constant dense<0.000000e+00> : vector<1xf32>
      %44 = vector.multi_reduction <add>, %43, %cst_19 [1, 2] : vector<1x1x128xf32> to vector<1xf32>
      %45 = vector.shape_cast %44 : vector<1xf32> to vector<1x1x1xf32>
      %46 = vector.extract %45[0, 0, 0] : f32 from vector<1x1x1xf32>
      %cst_20 = arith.constant 1.250000e-01 : f32
      %47 = arith.mulf %46, %cst_20 : f32
      %48 = vector.broadcast %47 : f32 to vector<8x128xf32>
      %c0_21 = arith.constant 0 : index
      %c0_22 = arith.constant 0 : index
      %49 = vector.load %arg5[%c0_21, %c0_22] : memref<8x128xf32, #tpu.memory_space<vmem>>, vector<8x128xf32>
      tpu.vector_store %arg5[%c0_21, %c0_22], %48 {strides = array<i32>} : memref<8x128xf32, #tpu.memory_space<vmem>>, vector<8x128xf32>,
    } else {
    }
    return
  }
  func.func @transform_0(%arg0: i32, %arg1: i32) -> (i32, i32) {
    %c1_i32 = arith.constant 1 : i32
    %0 = arith.muli %arg0, %c1_i32 : i32
    %1 = arith.addi %0, %arg1 : i32
    %c0_i32 = arith.constant 0 : i32
    %c0_i32_0 = arith.constant 0 : i32
    return %1, %c0_i32 : i32, i32
  }
  func.func @transform_1(%arg0: i32, %arg1: i32) -> (i32, i32) {
    %c1_i32 = arith.constant 1 : i32
    %0 = arith.muli %arg0, %c1_i32 : i32
    %1 = arith.addi %0, %arg1 : i32
    %c0_i32 = arith.constant 0 : i32
    %c0_i32_0 = arith.constant 0 : i32
    return %1, %c0_i32 : i32, i32
  }
  func.func @transform_2(%arg0: i32, %arg1: i32) -> (i32, i32) {
    %c1_i32 = arith.constant 1 : i32
    %0 = arith.muli %arg0, %c1_i32 : i32
    %1 = arith.addi %0, %arg1 : i32
    %c0_i32 = arith.constant 0 : i32
    %c0_i32_0 = arith.constant 0 : i32
    return %1, %c0_i32 : i32, i32
  }
  func.func @transform_3(%arg0: i32, %arg1: i32) -> (i32, i32) {
    %c0_i32 = arith.constant 0 : i32
    %c0_i32_0 = arith.constant 0 : i32
    return %arg0, %c0_i32 : i32, i32
  }
}

</mosaic_0001>

<bundles_post_ra>
// kernel: tpu_custom_call.1
= control target key start
LH: loop header
LB: loop body
LE: loop exit
PB: predicated region body
PF: predicated region fallthrough
CT: control target
= control target key end

     0   :  { %8 = vsyncpa [#allocation4], 0  ;;  %s247_s0 = inlined_call_operand.hbm [shape: f32[1,128], index: 0, kind: input, shape index: {}]   ;;  %s248_s1 = inlined_call_operand.vmem [shape: f32[1,128], index: 1, kind: input, shape index: {}]   ;;  %s249_s2 = inlined_call_operand.vmem [shape: f32[1,128], index: 2, kind: input, shape index: {}]   ;;  %s250_s3 = inlined_call_operand.hbm [shape: f32[8,128], index: 3, kind: output, shape index: {}]  }
   0x1   :  { %9 = vsyncpa [#allocation5], 0  ;;  %s212_s12 = smov [#allocation3]  }
   0x2   :  { %s19_s13 = sshll.u32 %s212_s12, 4  ;;  %s20_s13 = int_to_ptr.vmem [resolvable:$true] %s19_s13 }
   0x3   :  { %s176_s14 = scalar_lea.vmem %s20_s13, 16  ;;  %s180_s15 = scalar_lea.vmem %s20_s13, 32 }
   0x4   :  { %p177_p0 = scmp.ne.s32.totalorder %s20_s13, %s176_s14  ;;  %p181_p1 = scmp.lt.s32.totalorder %s20_s13, %s20_s13 }
   0x5   :  { %p182_p2 = scmp.lt.s32.totalorder %s180_s15, %s176_s14 }
   0x7   :  { %p183_p3 = por %p182_p2, %p181_p1 }
   0x9   :  { %p184_p4 = pnand %p183_p3, %p177_p0 }
   0xb   :  { %187 = shalt.err (!%p184_p4)
}
   0xc   :  { %22 = dma.hbm_to_vmem [thread:$0]  %s247_s0, 16, %s20_s13, [#allocation4]  }
   0xd   :  { %208 = dma.done.wait [#allocation4], 16  }
   0xe   :  { %209 = vsyncadd [#allocation4], 4294967280  ;;  %v213_v0 = vmov 0.0   ;;  %v65_v1 = vld [vmem:[#allocation3] sm:$0x1]  ;;  %v107_v8 = vlaneseq  ;;  %vm122_vm3 = vcmask 1040384  }
   0xf   :  { %64 = vst [vmem:[#allocation2] sm:$0x1] %v213_v0  ;;  %v68_v2 = vand.u32 2147483647, %v65_v1  ;;  %vm73_vm0 = vcmp.ge.f32.partialorder %v65_v1, 0.0  ;;  %v82_v17 = vmax.f32 %v65_v1, 0.0 }
  0x10   :  { %v66_v9 = vld [vmem:[%s248_s1] sm:$0x1]  ;;  %v108_v14 = vshrl.u32 %v107_v8, 7  ;;  %v110_v22 = vand.u32 127, %v107_v8  ;;  %s214_s1 = smov [#allocation6]  }
  0x11   :  { %v69_v3 = vsub.f32 0.0, %v68_v2  ;;  %v83_v18 = vmul.f32 %v66_v9, %v65_v1  ;;  %v67_v26 = vld [vmem:[%s249_s2] sm:$0x1]  ;;  %s142_s2 = sshll.u32 %s214_s1, 4  ;;  %s143_s2 = int_to_ptr.vmem [resolvable:$true] %s142_s2 }
  0x12   :  { %v111_v23 = vmul.u32 128, %v108_v14  ;;  %s188_s23 = scalar_lea.vmem %s143_s2, 128  ;;  %p193_p6 = scmp.lt.s32.totalorder %s143_s2, %s143_s2 }
  0x13   :  { %v70_v4 = vmul.f32 1.442695, %v69_v3  ;;  %v84_v25 = vsub.f32 %v82_v17, %v83_v18  ;;  %p189_p5 = scmp.ne.s32.totalorder %s143_s2, %s188_s23  ;;  %p194_p7 = scmp.lt.s32.totalorder %s188_s23, %s188_s23 }
  0x14   :  { %v112_v29 = vadd.s32 %v111_v23, %v110_v22 }
  0x15   :  { %162 = vpow2.f32 %v70_v4  ;;  %p195_p8 = por %p194_p7, %p193_p6 }
  0x16   :  { %vm113_vm2 = vcmp.lt.s32.totalorder %v112_v29, 64  ;;  %v115_v34 = vld [vmem:[#allocation2] sm:$0x1] }
  0x17   :  { %p196_p9 = pnand %p195_p8, %p189_p5 }
  0x22   :  { %v163_v5 = vpop.eup %162 }
  0x23   :  { %v72_v6 = vadd.f32 1.0, %v163_v5  ;;  %v88_v7 = vmul.f32 -0.5, %v163_v5  ;;  %v74_v10 = vsel %vm73_vm0, 1.0, %v163_v5  ;;  %v91_v12 = vand.u32 2147483647, %v163_v5 }
  0x25   :  { %164 = vrcp.f32 %v72_v6  ;;  %v89_v11 = vadd.f32 1.0, %v88_v7  ;;  %vm92_vm1 = vcmp.lt.f32.partialorder %v91_v12, 0.0004427343 }
  0x26   :  { %166 = vlog2.f32 %v72_v6 }
  0x27   :  { %v90_v20 = vmul.f32 %v163_v5, %v89_v11 }
  0x32   :  { %v165_v13 = vpop.eup %164 }
  0x33   :  { %v167_v15 = vpop.eup %166  ;;  %v76_v16 = vmul.f32 %v165_v13, %v74_v10 }
  0x34   :  { %v87_v19 = vmul.f32 0.6931472, %v167_v15 }
  0x35   :  { %v77_v21 = vmul.f32 %v76_v16, %v76_v16 }
  0x36   :  { %v93_v27 = vsel %vm92_vm1, %v90_v20, %v87_v19 }
  0x37   :  { %v78_v24 = vmul.f32 0.75, %v77_v21  ;;  %v94_v31 = vadd.f32 %v93_v27, %v84_v25 }
  0x39   :  { %v79_v28 = vsub.f32 %v66_v9, %v78_v24 }
  0x3b   :  { %v80_v30 = vmul.f32 %v79_v28, %v67_v26 }
  0x3d   :  { %v81_v32 = vadd.f32 %v80_v30, %v78_v24 }
  0x3f   :  { %v95_v33 = vmul.f32 %v94_v31, %v81_v32 }
  0x41   :  { %v114_v35 = vsel %vm113_vm2, %v95_v33, 0.0 }
  0x42   :  { %v116_v36 = vadd.f32 %v115_v34, %v114_v35 }
  0x44   :  { %117 = vst [vmem:[#allocation2] sm:$0x1] %v116_v36 }
  0x4b   :  { %v121_v37 = vld [vmem:[#allocation2] sm:$0x1] }
  0x4c   :  { %v123_v38 = vsel %vm122_vm3, %v121_v37, 0.0 }
  0x4d   :  { %124 = vadd.xlane.f32.xlu0 %v123_v38 }
  0xd6   :  { %v125_v39 = vpop.xlane.xlu0 %124 }
  0xd7   :  { %v126_v40 = vrot.slane %v125_v39, 4 }
  0xd9   :  { %v127_v41 = vadd.f32 %v126_v40, %v125_v39 }
  0xdb   :  { %v128_v42 = vrot.slane %v127_v41, 2 }
  0xdd   :  { %v129_v43 = vadd.f32 %v128_v42, %v127_v41 }
  0xdf   :  { %v130_v44 = vrot.slane %v129_v43, 1 }
  0xe1   :  { %v131_v45 = vadd.f32 %v130_v44, %v129_v43 }
  0xe3   :  { %157 = vpush %v131_v45 }
 0x114   :  { %s158_s21 = spop %157 }
 0x115   :  { %s133_s22 = smul.f32 0.125, %s158_s21 }
 0x117   :  { %v134_v46 = vstv %s133_s22 }
 0x118   :  { %135 = vst [vmem:[#allocation6] sm:$0xff] %v134_v46 }
 0x119   :  { %199 = shalt.err (!%p196_p9)
}
 0x11a   :  { %145 = dma.vmem_to_hbm [thread:$0]  %s143_s2, 128, %s250_s3, [#allocation5]  }
 0x11b   :  { %210 = dma.done.wait [#allocation5], 128  }
 0x11c   :  { %211 = vsyncadd [#allocation5], 4294967168 }
 0x11d   :  { %149 = vsyncpa [#allocation4], 1 }
 0x11e   :  { %150 = vsyncpa [#allocation5], 1 }

</bundles_post_ra>
